<compile_context>
chip_gen: v7x
topology: tpu7x:2x2x1
jax: 0.10.0
libtpu: 0.0.40
codegen_flags: <defaults>
</compile_context>

<pallas_src>
import math

import jax
import jax.numpy as jnp
from jax import lax
from jax.experimental import pallas as pl
from jax.experimental.pallas import tpu as pltpu

_EPS = 1e-8                                # PyTorch F.cosine_similarity default eps
_TARGET_BLOCK_BYTES = 4 * 1024 * 1024      # ~4 MiB per input block
_VMEM_LIMIT_BYTES = 48 * 1024 * 1024       # explicit scoped-VMEM limit (v5e default is 16 MiB)


def _make_kernel(g: int, d: int):
    """Kernel for blocks of shape (tile, g*d); g row-segments folded per lane row."""
    eps2 = float(_EPS) * float(_EPS)

    def kernel(a_ref, b_ref, o_ref):
        a = a_ref[...].astype(jnp.float32)          # (tile, g*d)
        b = b_ref[...].astype(jnp.float32)
        dots, ssas, ssbs = [], [], []
        for p in range(g):                          # static unroll, g in {1..16}
            ap = a if g == 1 else a[:, p * d:(p + 1) * d]
            bp = b if g == 1 else b[:, p * d:(p + 1) * d]
            # VPU products, XLU lane reductions.
            dots.append(jnp.sum(ap * bp, axis=-1, keepdims=True))
            ssas.append(jnp.sum(ap * ap, axis=-1, keepdims=True))
            ssbs.append(jnp.sum(bp * bp, axis=-1, keepdims=True))
        if g == 1:
            dot, ssa, ssb = dots[0], ssas[0], ssbs[0]
        else:
            dot = jnp.concatenate(dots, axis=-1)    # (tile, g)
            ssa = jnp.concatenate(ssas, axis=-1)
            ssb = jnp.concatenate(ssbs, axis=-1)
        # max(||a||,eps)*max(||b||,eps): two EUP rsqrts (batched over all g
        # segments), kept separate to avoid f32 overflow of ssa*ssb.
        inv = lax.rsqrt(jnp.maximum(ssa, eps2)) * lax.rsqrt(jnp.maximum(ssb, eps2))
        o_ref[...] = ((dot * inv + 1.0) * 0.5).astype(o_ref.dtype)

    return kernel


def _pick_tile(nf: int, w: int, itemsize: int, target_bytes: int) -> int:
    """Largest sublane-aligned row tile such that one input block ~= target_bytes."""
    rows = target_bytes // (w * itemsize)
    rows = max(8, (rows // 8) * 8)
    if rows >= nf:
        return nf          # single block: block dim == full array dim (always legal)
    return rows
    # TODO(synk): for extremely large D (8*w*itemsize >> VMEM budget) a D-axis
    # reduction split (accumulators + pl.when init/finalize) would be needed.


def cos_similarity(a, b, *, block_bytes=_TARGET_BLOCK_BYTES):
    """(cosine_similarity(a, b, dim=-1) + 1) / 2, computed in a Pallas TPU kernel."""
    assert a.shape == b.shape, "a and b must have the same shape"
    *batch, d = a.shape
    n = math.prod(batch) if batch else 1
    out_dtype = a.dtype
    itemsize = jnp.dtype(a.dtype).itemsize

    a2 = a.reshape(n, d)
    b2 = b.reshape(n, d)

    # Fold small feature dims into lanes: (n, d) -> (n/g, g*d), g = 128//d.
    if 8 <= d < 128 and 128 % d == 0:
        g = 128 // d
    else:
        g = 1
    n_pad = -(-n // g) * g
    if n_pad != n:
        a2 = jnp.pad(a2, ((0, n_pad - n), (0, 0)))   # zero rows -> finite 0.5, sliced off
        b2 = jnp.pad(b2, ((0, n_pad - n), (0, 0)))
    nf, w = n_pad // g, g * d
    af = a2.reshape(nf, w)
    bf = b2.reshape(nf, w)

    tile = _pick_tile(nf, w, itemsize, block_bytes)
    grid = (pl.cdiv(nf, tile),)

    cost = pl.CostEstimate(
        flops=int(6 * n * d + 8 * n),
        transcendentals=int(2 * n),
        bytes_accessed=int(2 * n * d * itemsize + n * jnp.dtype(out_dtype).itemsize),
    )

    out = pl.pallas_call(
        _make_kernel(g, d),
        out_shape=jax.ShapeDtypeStruct((nf, g), out_dtype),
        grid=grid,
        in_specs=[
            pl.BlockSpec((tile, w), lambda i: (i, 0)),
            pl.BlockSpec((tile, w), lambda i: (i, 0)),
        ],
        out_specs=pl.BlockSpec((tile, g), lambda i: (i, 0)),
        compiler_params=pltpu.CompilerParams(
            dimension_semantics=("parallel",),
            vmem_limit_bytes=_VMEM_LIMIT_BYTES,
        ),
        cost_estimate=cost,
    )(af, bf)

    # (nf, g) row-major flatten restores original row order r = f*g + p.
    out_flat = out.reshape(nf * g)[:n]
    return out_flat.reshape(tuple(batch))


def _reference(a, b):
    a = a.astype(jnp.float32)
    b = b.astype(jnp.float32)
    dot = jnp.sum(a * b, axis=-1)
    na = jnp.maximum(jnp.sqrt(jnp.sum(a * a, axis=-1)), _EPS)
    nb = jnp.maximum(jnp.sqrt(jnp.sum(b * b, axis=-1)), _EPS)
    return (dot / (na * nb) + 1.0) * 0.5


def _check(key, shape, block_bytes=_TARGET_BLOCK_BYTES):
    ka, kb = jax.random.split(key)
    a = jax.random.normal(ka, shape, dtype=jnp.float32)
    b = jax.random.normal(kb, shape, dtype=jnp.float32)
    out = cos_similarity(a, b, block_bytes=block_bytes)
    jax.block_until_ready(out)
    ref = _reference(a, b)
    assert out.shape == shape[:-1], (out.shape, shape)
    err = float(jnp.max(jnp.abs(out.astype(jnp.float32) - ref)))
    assert jnp.allclose(out.astype(jnp.float32), ref, atol=1e-5, rtol=1e-4), err
    return out


if __name__ == "__main__":
    key = jax.random.PRNGKey(0)
    k1, k2, k3, k4 = jax.random.split(key, 4)

    # Module-typical small shape (batch=2, seq=8, hidden=32): folded g=4, single block.
    _check(k1, (2, 8, 32))
    # Row count not divisible by the fold factor g=4: exercises the pad+slice path.
    _check(k2, (2, 7, 32))
    # D >= 128: multi-block grid with an uneven tail (small block target forces tiling).
    _check(k3, (3, 700, 128), block_bytes=64 * 1024)
    # Folded D=32 with a multi-block grid and an uneven tail.
    _check(k4, (3, 700, 32), block_bytes=64 * 1024)

    print("KERNEL_OK")
</pallas_src>

<mosaic_0001>
module attributes {stable_mosaic.version = 11 : i64} {
  func.func @kernel(%arg0: i32, %arg1: memref<4x128xf32, #tpu.memory_space<vmem>>, %arg2: memref<4x128xf32, #tpu.memory_space<vmem>>, %arg3: memref<4x4xf32, #tpu.memory_space<vmem>>) attributes {dimension_semantics = [#tpu.dimension_semantics<parallel>], iteration_bounds = array<i64: 1>, scalar_prefetch = 0 : i64, scratch_operands = 0 : i64, tpu.core_type = #tpu.core_type<tc>, window_params = [{transform_indices = @transform_0, window_bounds = array<i64: 4, 128>}, {transform_indices = @transform_1, window_bounds = array<i64: 4, 128>}, {transform_indices = @transform_2, window_bounds = array<i64: 4, 4>}]} {
    %c0 = arith.constant 0 : index
    %c0_0 = arith.constant 0 : index
    %0 = vector.load %arg1[%c0, %c0_0] : memref<4x128xf32, #tpu.memory_space<vmem>>, vector<4x128xf32>
    %c0_1 = arith.constant 0 : index
    %c0_2 = arith.constant 0 : index
    %1 = vector.load %arg2[%c0_1, %c0_2] : memref<4x128xf32, #tpu.memory_space<vmem>>, vector<4x128xf32>
    %2 = vector.extract_strided_slice %0 {offsets = [0, 0], sizes = [4, 32], strides = [1, 1]} : vector<4x128xf32> to vector<4x32xf32>
    %3 = vector.extract_strided_slice %1 {offsets = [0, 0], sizes = [4, 32], strides = [1, 1]} : vector<4x128xf32> to vector<4x32xf32>
    %4 = arith.mulf %2, %3 : vector<4x32xf32>
    %cst = arith.constant dense<0.000000e+00> : vector<4xf32>
    %5 = vector.multi_reduction <add>, %4, %cst [1] : vector<4x32xf32> to vector<4xf32>
    %6 = vector.shape_cast %5 : vector<4xf32> to vector<4x1xf32>
    %7 = arith.mulf %2, %2 : vector<4x32xf32>
    %cst_3 = arith.constant dense<0.000000e+00> : vector<4xf32>
    %8 = vector.multi_reduction <add>, %7, %cst_3 [1] : vector<4x32xf32> to vector<4xf32>
    %9 = vector.shape_cast %8 : vector<4xf32> to vector<4x1xf32>
    %10 = arith.mulf %3, %3 : vector<4x32xf32>
    %cst_4 = arith.constant dense<0.000000e+00> : vector<4xf32>
    %11 = vector.multi_reduction <add>, %10, %cst_4 [1] : vector<4x32xf32> to vector<4xf32>
    %12 = vector.shape_cast %11 : vector<4xf32> to vector<4x1xf32>
    %13 = vector.extract_strided_slice %0 {offsets = [0, 32], sizes = [4, 32], strides = [1, 1]} : vector<4x128xf32> to vector<4x32xf32>
    %14 = vector.extract_strided_slice %1 {offsets = [0, 32], sizes = [4, 32], strides = [1, 1]} : vector<4x128xf32> to vector<4x32xf32>
    %15 = arith.mulf %13, %14 : vector<4x32xf32>
    %cst_5 = arith.constant dense<0.000000e+00> : vector<4xf32>
    %16 = vector.multi_reduction <add>, %15, %cst_5 [1] : vector<4x32xf32> to vector<4xf32>
    %17 = vector.shape_cast %16 : vector<4xf32> to vector<4x1xf32>
    %18 = arith.mulf %13, %13 : vector<4x32xf32>
    %cst_6 = arith.constant dense<0.000000e+00> : vector<4xf32>
    %19 = vector.multi_reduction <add>, %18, %cst_6 [1] : vector<4x32xf32> to vector<4xf32>
    %20 = vector.shape_cast %19 : vector<4xf32> to vector<4x1xf32>
    %21 = arith.mulf %14, %14 : vector<4x32xf32>
    %cst_7 = arith.constant dense<0.000000e+00> : vector<4xf32>
    %22 = vector.multi_reduction <add>, %21, %cst_7 [1] : vector<4x32xf32> to vector<4xf32>
    %23 = vector.shape_cast %22 : vector<4xf32> to vector<4x1xf32>
    %24 = vector.extract_strided_slice %0 {offsets = [0, 64], sizes = [4, 32], strides = [1, 1]} : vector<4x128xf32> to vector<4x32xf32>
    %25 = vector.extract_strided_slice %1 {offsets = [0, 64], sizes = [4, 32], strides = [1, 1]} : vector<4x128xf32> to vector<4x32xf32>
    %26 = arith.mulf %24, %25 : vector<4x32xf32>
    %cst_8 = arith.constant dense<0.000000e+00> : vector<4xf32>
    %27 = vector.multi_reduction <add>, %26, %cst_8 [1] : vector<4x32xf32> to vector<4xf32>
    %28 = vector.shape_cast %27 : vector<4xf32> to vector<4x1xf32>
    %29 = arith.mulf %24, %24 : vector<4x32xf32>
    %cst_9 = arith.constant dense<0.000000e+00> : vector<4xf32>
    %30 = vector.multi_reduction <add>, %29, %cst_9 [1] : vector<4x32xf32> to vector<4xf32>
    %31 = vector.shape_cast %30 : vector<4xf32> to vector<4x1xf32>
    %32 = arith.mulf %25, %25 : vector<4x32xf32>
    %cst_10 = arith.constant dense<0.000000e+00> : vector<4xf32>
    %33 = vector.multi_reduction <add>, %32, %cst_10 [1] : vector<4x32xf32> to vector<4xf32>
    %34 = vector.shape_cast %33 : vector<4xf32> to vector<4x1xf32>
    %35 = vector.extract_strided_slice %0 {offsets = [0, 96], sizes = [4, 32], strides = [1, 1]} : vector<4x128xf32> to vector<4x32xf32>
    %36 = vector.extract_strided_slice %1 {offsets = [0, 96], sizes = [4, 32], strides = [1, 1]} : vector<4x128xf32> to vector<4x32xf32>
    %37 = arith.mulf %35, %36 : vector<4x32xf32>
    %cst_11 = arith.constant dense<0.000000e+00> : vector<4xf32>
    %38 = vector.multi_reduction <add>, %37, %cst_11 [1] : vector<4x32xf32> to vector<4xf32>
    %39 = vector.shape_cast %38 : vector<4xf32> to vector<4x1xf32>
    %40 = arith.mulf %35, %35 : vector<4x32xf32>
    %cst_12 = arith.constant dense<0.000000e+00> : vector<4xf32>
    %41 = vector.multi_reduction <add>, %40, %cst_12 [1] : vector<4x32xf32> to vector<4xf32>
    %42 = vector.shape_cast %41 : vector<4xf32> to vector<4x1xf32>
    %43 = arith.mulf %36, %36 : vector<4x32xf32>
    %cst_13 = arith.constant dense<0.000000e+00> : vector<4xf32>
    %44 = vector.multi_reduction <add>, %43, %cst_13 [1] : vector<4x32xf32> to vector<4xf32>
    %45 = vector.shape_cast %44 : vector<4xf32> to vector<4x1xf32>
    %46 = tpu.concatenate %6, %17, %28, %39 in 1 : vector<4x1xf32>, vector<4x1xf32>, vector<4x1xf32>, vector<4x1xf32> -> vector<4x4xf32>
    %47 = tpu.concatenate %9, %20, %31, %42 in 1 : vector<4x1xf32>, vector<4x1xf32>, vector<4x1xf32>, vector<4x1xf32> -> vector<4x4xf32>
    %48 = tpu.concatenate %12, %23, %34, %45 in 1 : vector<4x1xf32>, vector<4x1xf32>, vector<4x1xf32>, vector<4x1xf32> -> vector<4x4xf32>
    %cst_14 = arith.constant 1.000000e-16 : f32
    %49 = vector.broadcast %cst_14 : f32 to vector<4x4xf32>
    %50 = arith.maximumf %47, %49 : vector<4x4xf32>
    %51 = math.rsqrt %50 : vector<4x4xf32>
    %cst_15 = arith.constant 1.000000e-16 : f32
    %52 = vector.broadcast %cst_15 : f32 to vector<4x4xf32>
    %53 = arith.maximumf %48, %52 : vector<4x4xf32>
    %54 = math.rsqrt %53 : vector<4x4xf32>
    %55 = arith.mulf %51, %54 : vector<4x4xf32>
    %56 = arith.mulf %46, %55 : vector<4x4xf32>
    %cst_16 = arith.constant 1.000000e+00 : f32
    %57 = vector.broadcast %cst_16 : f32 to vector<4x4xf32>
    %58 = arith.addf %56, %57 : vector<4x4xf32>
    %cst_17 = arith.constant 5.000000e-01 : f32
    %59 = vector.broadcast %cst_17 : f32 to vector<4x4xf32>
    %60 = arith.mulf %58, %59 : vector<4x4xf32>
    %c0_18 = arith.constant 0 : index
    %c0_19 = arith.constant 0 : index
    %61 = vector.load %arg3[%c0_18, %c0_19] : memref<4x4xf32, #tpu.memory_space<vmem>>, vector<4x4xf32>
    tpu.vector_store %arg3[%c0_18, %c0_19], %60 {strides = array<i32>} : memref<4x4xf32, #tpu.memory_space<vmem>>, vector<4x4xf32>,
    return
  }
  func.func @transform_0(%arg0: i32) -> (i32, i32) {
    %c0_i32 = arith.constant 0 : i32
    %c0_i32_0 = arith.constant 0 : i32
    return %arg0, %c0_i32 : i32, i32
  }
  func.func @transform_1(%arg0: i32) -> (i32, i32) {
    %c0_i32 = arith.constant 0 : i32
    %c0_i32_0 = arith.constant 0 : i32
    return %arg0, %c0_i32 : i32, i32
  }
  func.func @transform_2(%arg0: i32) -> (i32, i32) {
    %c0_i32 = arith.constant 0 : i32
    %c0_i32_0 = arith.constant 0 : i32
    return %arg0, %c0_i32 : i32, i32
  }
}

</mosaic_0001>

<bundles_post_ra>
// kernel: tpu_custom_call.1
= control target key start
LH: loop header
LB: loop body
LE: loop exit
PB: predicated region body
PF: predicated region fallthrough
CT: control target
= control target key end

     0   :  { %7 = vsyncpa [#allocation3], 0  ;;  %s306_s0 = inlined_call_operand.hbm [shape: f32[4,128], index: 0, kind: input, shape index: {}]   ;;  %s307_s1 = inlined_call_operand.hbm [shape: f32[4,128], index: 1, kind: input, shape index: {}]   ;;  %s308_s2 = inlined_call_operand.hbm [shape: f32[4,4], index: 2, kind: output, shape index: {}]  }
   0x1   :  { %8 = vsyncpa [#allocation6], 0 }
   0x2   :  { %9 = vsyncpa [#allocation4], 0  ;;  %s228_s9 = smov [#allocation2]   ;;  %s229_s11 = smov [#allocation5]  }
   0x3   :  { %s16_s10 = sshll.u32 %s228_s9, 4  ;;  %s26_s12 = sshll.u32 %s229_s11, 4  ;;  %s17_s10 = int_to_ptr.vmem [resolvable:$true] %s16_s10  ;;  %s27_s12 = int_to_ptr.vmem [resolvable:$true] %s26_s12 }
   0x4   :  { %s156_s15 = scalar_lea.hbm %s306_s0, 64 }
   0x5   :  { %p157_p0 = scmp.ne.s32.totalorder %s306_s0, %s156_s15  ;;  %p160_p1 = scmp.lt.u32.totalorder %s156_s15, %s306_s0 }
   0x7   :  { %p162_p2 = pnand %p160_p1, %p157_p0 }
   0x9   :  { %165 = shalt.err (!%p162_p2)
}
   0xa   :  { %s166_s20 = scalar_lea.vmem %s17_s10, 64  ;;  %p171_p4 = scmp.lt.s32.totalorder %s17_s10, %s17_s10 }
   0xb   :  { %p167_p3 = scmp.ne.s32.totalorder %s17_s10, %s166_s20  ;;  %p172_p5 = scmp.lt.s32.totalorder %s166_s20, %s166_s20 }
   0xd   :  { %p173_p6 = por %p172_p5, %p171_p4 }
   0xf   :  { %p174_p7 = pnand %p173_p6, %p167_p3 }
  0x11   :  { %177 = shalt.err (!%p174_p7)
}
  0x12   :  { %19 = dma.hbm_to_vmem [thread:$0]  %s306_s0, 64, %s17_s10, [#allocation3]  }
  0x13   :  { %s178_s25 = scalar_lea.hbm %s307_s1, 64 }
  0x14   :  { %p179_p8 = scmp.ne.s32.totalorder %s307_s1, %s178_s25  ;;  %p182_p9 = scmp.lt.u32.totalorder %s178_s25, %s307_s1 }
  0x16   :  { %p184_p10 = pnand %p182_p9, %p179_p8 }
  0x18   :  { %187 = shalt.err (!%p184_p10)
}
  0x19   :  { %s188_s30 = scalar_lea.vmem %s27_s12, 64  ;;  %p193_p12 = scmp.lt.s32.totalorder %s27_s12, %s27_s12 }
  0x1a   :  { %p189_p11 = scmp.ne.s32.totalorder %s27_s12, %s188_s30  ;;  %p194_p13 = scmp.lt.s32.totalorder %s188_s30, %s188_s30 }
  0x1c   :  { %p195_p0 = por %p194_p13, %p193_p12 }
  0x1e   :  { %p196_p1 = pnand %p195_p0, %p189_p11 }
  0x20   :  { %199 = shalt.err (!%p196_p1)
}
  0x21   :  { %29 = dma.hbm_to_vmem [thread:$0]  %s307_s1, 64, %s27_s12, [#allocation6]  }
  0x22   :  { %222 = dma.done.wait [#allocation3], 64  }
  0x23   :  { %223 = vsyncadd [#allocation3], 4294967232 }
  0x24   :  { %224 = dma.done.wait [#allocation6], 64  }
  0x25   :  { %225 = vsyncadd [#allocation6], 4294967232  ;;  %v37_v0 = vld [vmem:[#allocation5] sm:$0xf]  ;;  %vm39_vm0 = vcmask 257024   ;;  %s230_s1 = smov 96  }
  0x26   :  { %v36_v1 = vld [vmem:[#allocation2] sm:$0xf]  ;;  %v47_v2 = vmul.f32 %v37_v0, %v37_v0  ;;  %s231_s4 = smov 64   ;;  %s232_s5 = smov 32   ;;  %vm108_vm1 = vcmask 7168   ;;  %vm112_vm2 = vcmask 23552  }
  0x27   :  { %v38_v3 = vmul.f32 %v37_v0, %v36_v1  ;;  %v43_v4 = vmul.f32 %v36_v1, %v36_v1  ;;  %vm110_vm3 = vcmask 15360   ;;  %s233_s6 = smov [#allocation7]   ;;  %vm128_vm4 = vcmask 27648  }
  0x28   :  { %v48_v5 = vsel %vm39_vm0, %v47_v2, 0.0  ;;  %s136_s7 = sshll.u32 %s233_s6, 4  ;;  %s137_s7 = int_to_ptr.vmem [resolvable:$true] %s136_s7 }
  0x29   :  { %v40_v6 = vsel %vm39_vm0, %v38_v3, 0.0  ;;  %49 = vadd.xlane.f32.xlu1 %v48_v5  ;;  %v44_v7 = vsel %vm39_vm0, %v43_v4, 0.0  ;;  %s200_s8 = scalar_lea.vmem %s137_s7, 64  ;;  %p205_p3 = scmp.lt.s32.totalorder %s137_s7, %s137_s7 }
  0x2a   :  { %41 = vadd.xlane.f32.xlu0 %v40_v6  ;;  %p201_p2 = scmp.ne.s32.totalorder %s137_s7, %s200_s8  ;;  %p206_p4 = scmp.lt.s32.totalorder %s200_s8, %s200_s8 }
  0x2c   :  { %p207_p5 = por %p206_p4, %p205_p3 }
  0x2e   :  { %45 = vadd.xlane.f32.xlu0 %v44_v7  ;;  %p208_p6 = pnand %p207_p5, %p201_p2 }
  0x3a   :  { %52 = vrot.lane.b32.xlu1 %v38_v3, %s230_s1 }
  0x3e   :  { %72 = vrot.lane.b32.xlu1 %v38_v3, %s231_s4 }
  0x42   :  { %84 = vrot.lane.b32.xlu1 %v47_v2, %s231_s4 }
  0x44   :  { %59 = vrot.lane.b32.xlu0 %v43_v4, %s230_s1 }
  0x46   :  { %96 = vrot.lane.b32.xlu1 %v43_v4, %s232_s5 }
  0x48   :  { %66 = vrot.lane.b32.xlu0 %v47_v2, %s230_s1 }
  0x4a   :  { %102 = vrot.lane.b32.xlu1 %v47_v2, %s232_s5 }
  0x4c   :  { %78 = vrot.lane.b32.xlu0 %v43_v4, %s231_s4 }
  0x50   :  { %90 = vrot.lane.b32.xlu0 %v38_v3, %s232_s5 }
  0xb6   :  { %v50_v8 = vpop.xlane.xlu1 %49 }
  0xb7   :  { %v42_v9 = vpop.xlane.xlu0 %41 }
  0xba   :  { %v53_v10 = vpop.permute.xlu1 %52 }
  0xbb   :  { %v46_v11 = vpop.xlane.xlu0 %45  ;;  %v55_v12 = vsel %vm39_vm0, %v53_v10, 0.0 }
  0xbc   :  { %56 = vadd.xlane.f32.xlu0 %v55_v12 }
  0xbe   :  { %v73_v14 = vpop.permute.xlu1 %72 }
  0xbf   :  { %v60_v13 = vpop.permute.xlu0 %59  ;;  %v75_v16 = vsel %vm39_vm0, %v73_v14, 0.0 }
  0xc0   :  { %v62_v15 = vsel %vm39_vm0, %v60_v13, 0.0 }
  0xc1   :  { %63 = vadd.xlane.f32.xlu1 %v62_v15 }
  0xc2   :  { %v85_v18 = vpop.permute.xlu1 %84 }
  0xc3   :  { %v67_v17 = vpop.permute.xlu0 %66  ;;  %v87_v20 = vsel %vm39_vm0, %v85_v18, 0.0 }
  0xc4   :  { %v69_v19 = vsel %vm39_vm0, %v67_v17, 0.0 }
  0xc5   :  { %76 = vadd.xlane.f32.xlu1 %v75_v16  ;;  %70 = vadd.xlane.f32.xlu0 %v69_v19 }
  0xc6   :  { %v97_v22 = vpop.permute.xlu1 %96 }
  0xc7   :  { %v79_v21 = vpop.permute.xlu0 %78  ;;  %v99_v24 = vsel %vm39_vm0, %v97_v22, 0.0 }
  0xc8   :  { %v81_v23 = vsel %vm39_vm0, %v79_v21, 0.0 }
  0xc9   :  { %88 = vadd.xlane.f32.xlu1 %v87_v20  ;;  %82 = vadd.xlane.f32.xlu0 %v81_v23 }
  0xca   :  { %v103_v26 = vpop.permute.xlu1 %102 }
  0xcb   :  { %v91_v25 = vpop.permute.xlu0 %90  ;;  %v105_v28 = vsel %vm39_vm0, %v103_v26, 0.0 }
  0xcc   :  { %v93_v27 = vsel %vm39_vm0, %v91_v25, 0.0 }
  0xcd   :  { %100 = vadd.xlane.f32.xlu1 %v99_v24  ;;  %94 = vadd.xlane.f32.xlu0 %v93_v27 }
  0xd1   :  { %106 = vadd.xlane.f32.xlu0 %v105_v28 }
 0x149   :  { %v57_v29 = vpop.xlane.xlu0 %56 }
 0x14a   :  { %v109_v48 = vsel %vm108_vm1, %v42_v9, %v57_v29 }
 0x14e   :  { %v64_v30 = vpop.xlane.xlu1 %63 }
 0x14f   :  { %v114_v35 = vsel %vm108_vm1, %v46_v11, %v64_v30 }
 0x152   :  { %v77_v31 = vpop.xlane.xlu1 %76  ;;  %v71_v32 = vpop.xlane.xlu0 %70 }
 0x153   :  { %v117_v40 = vsel %vm108_vm1, %v50_v8, %v71_v32  ;;  %v111_v49 = vsel %vm110_vm3, %v109_v48, %v77_v31 }
 0x156   :  { %v89_v33 = vpop.xlane.xlu1 %88  ;;  %v83_v34 = vpop.xlane.xlu0 %82 }
 0x157   :  { %v115_v36 = vsel %vm110_vm3, %v114_v35, %v83_v34  ;;  %v118_v42 = vsel %vm110_vm3, %v117_v40, %v89_v33 }
 0x15a   :  { %v101_v37 = vpop.xlane.xlu1 %100  ;;  %v95_v38 = vpop.xlane.xlu0 %94 }
 0x15b   :  { %v116_v39 = vsel %vm112_vm2, %v115_v36, %v101_v37  ;;  %v113_v51 = vsel %vm112_vm2, %v111_v49, %v95_v38 }
 0x15c   :  { %v120_v41 = vmax.f32 %v116_v39, 1e-16 }
 0x15e   :  { %v107_v43 = vpop.xlane.xlu0 %106  ;;  %152 = vrsqrt.f32 %v120_v41 }
 0x15f   :  { %v119_v44 = vsel %vm112_vm2, %v118_v42, %v107_v43 }
 0x160   :  { %v122_v45 = vmax.f32 %v119_v44, 1e-16 }
 0x162   :  { %154 = vrsqrt.f32 %v122_v45 }
 0x168   :  { %v153_v46 = vpop.eup %152 }
 0x16c   :  { %v155_v47 = vpop.eup %154 }
 0x16d   :  { %v124_v50 = vmul.f32 %v155_v47, %v153_v46 }
 0x16f   :  { %v125_v52 = vmul.f32 %v124_v50, %v113_v51 }
 0x171   :  { %v126_v53 = vadd.f32 1.0, %v125_v52 }
 0x173   :  { %v127_v54 = vmul.f32 0.5, %v126_v53 }
 0x175   :  { %129 = vst.msk [vmem:[#allocation7] sm:$0xf] %vm128_vm4, %v127_v54 }
 0x176   :  { %211 = shalt.err (!%p208_p6)
}
 0x177   :  { %s212_s11 = scalar_lea.hbm %s308_s2, 64 }
 0x178   :  { %p213_p7 = scmp.ne.s32.totalorder %s308_s2, %s212_s11  ;;  %p216_p8 = scmp.lt.u32.totalorder %s212_s11, %s308_s2 }
 0x17a   :  { %p218_p9 = pnand %p216_p8, %p213_p7 }
 0x17c   :  { %221 = shalt.err (!%p218_p9)
}
 0x17d   :  { %139 = dma.vmem_to_hbm [thread:$0]  %s137_s7, 64, %s308_s2, [#allocation4]  }
 0x17e   :  { %226 = dma.done.wait [#allocation4], 64  }
 0x17f   :  { %227 = vsyncadd [#allocation4], 4294967232 }
 0x180   :  { %143 = vsyncpa [#allocation3], 1 }
 0x181   :  { %144 = vsyncpa [#allocation6], 1 }
 0x182   :  { %145 = vsyncpa [#allocation4], 1 }

</bundles_post_ra>
